<compile_context>
chip_gen: v7x
topology: tpu7x:2x2x1
jax: 0.10.0
libtpu: 0.0.40
codegen_flags: <defaults>
</compile_context>

<pallas_src>
import functools

import jax
import jax.numpy as jnp
import numpy as np
from jax.experimental import pallas as pl
from jax.experimental.pallas import tpu as pltpu


_NEG_INF = -1e30  # finite "minus infinity": avoids inf-inf NaN corner cases


def _cdiv(a, b):
    return -(-a // b)


# ----------------------------------------------------------------------------
# Kernel: per-split online-LSE partials for loss1 + P[T] gather for loss2.
# ----------------------------------------------------------------------------
def _mp_partial_kernel(tcol_ref, xpos_ref, anc_ref, prox_ref, w_ref,
                       m_ref, l_ref, tgt_ref, ptn_ref, pt_ref,
                       sanc_sc, *, n_inner, n_classes, c_padded):
    B, D = xpos_ref.shape
    tile_c = prox_ref.shape[0]
    k = pl.program_id(1)
    base = (pl.program_id(0) * n_inner + k) * tile_c
    w = w_ref[0, 0]

    xb = xpos_ref[...]                                    # (B, D) bf16 (resident)
    ab = anc_ref[...]                                     # (B, D) bf16 (resident)

    # s_anchor = out_positive @ out_anchor^T, once per split (tiny scratch).
    @pl.when(k == 0)
    def _():
        sanc_sc[...] = jax.lax.dot_general(
            xb, ab, (((1,), (1,)), ((), ())),
            preferred_element_type=jnp.float32)           # (B, B) f32

    p = prox_ref[...]                                     # (tile_c, D) bf16/f32
    p_bf = p if p.dtype == jnp.bfloat16 else p.astype(jnp.bfloat16)
    p32 = p.astype(jnp.float32)

    # Squared row norms as a lane-major (1, tile_c) row via a 1-row f32 matmul:
    # keeps the per-column scale in the layout the (B, tile_c) scores need and
    # avoids both a normalized (tile_c, D) copy and a (tile_c,1) relayout.
    ones_row = jnp.ones((1, D), jnp.float32)
    norms2 = jax.lax.dot_general(
        ones_row, p32 * p32, (((1,), (1,)), ((), ())),
        preferred_element_type=jnp.float32)               # (1, tile_c)
    inv_n = jax.lax.rsqrt(jnp.maximum(norms2, jnp.float32(1e-24)))

    # label / class-index comparisons
    col_g = jax.lax.broadcasted_iota(jnp.int32, (B, tile_c), 1) + base
    hit = col_g == tcol_ref[...]                          # (B, tile_c) bool
    hit_f = hit.astype(jnp.float32)

    # base scores against the RAW proxies (bf16 MXU operands, f32 accumulate);
    # normalization applied afterwards as a per-column scale.
    s_base = jax.lax.dot_general(
        xb, p_bf, (((1,), (1,)), ((), ())),
        preferred_element_type=jnp.float32)               # (B, tile_c)

    # torch `new_center[T] = out_anchor`, applied in score space: columns hit
    # by a label take the matching column of s_anchor.  Kept f32 (K=B matmul)
    # so the TARGET logit keeps full precision; MXU has ample slack here.
    # TODO(synk): assumes labels are unique within the batch (duplicates sum).
    corr = jnp.dot(sanc_sc[...], hit_f,
                   preferred_element_type=jnp.float32)    # (B, tile_c)
    col_hit = jnp.sum(hit_f, axis=0, keepdims=True) > 0.0  # (1, tile_c)

    sc = jnp.where(col_hit, corr, s_base * inv_n) * w
    if c_padded != n_classes:                             # mask padded classes
        sc = jnp.where(col_g < n_classes, sc, jnp.float32(_NEG_INF))
    # NOTE: bias b is omitted -- CE / log-softmax / argmax are invariant to it.

    tgt_tile = jnp.sum(jnp.where(hit, sc, 0.0), axis=1, keepdims=True)   # (B,1)
    ptn_tile = jnp.sum(jnp.where(hit, inv_n, 0.0), axis=1, keepdims=True)
    pt_tile = jnp.dot(hit.astype(jnp.bfloat16), p_bf,
                      preferred_element_type=jnp.float32)  # (B, D) raw P[T]
    m_tile = jnp.max(sc, axis=1, keepdims=True)

    if n_inner == 1:
        # single class tile per split: plain LSE, no recurrence
        m_ref[...] = m_tile
        l_ref[...] = jnp.sum(jnp.exp(sc - m_tile), axis=1, keepdims=True)
        tgt_ref[...] = tgt_tile
        ptn_ref[...] = ptn_tile
        pt_ref[...] = pt_tile
    else:
        @pl.when(k == 0)
        def _():
            m_ref[...] = jnp.full_like(m_ref, _NEG_INF)
            l_ref[...] = jnp.zeros_like(l_ref)
            tgt_ref[...] = jnp.zeros_like(tgt_ref)
            ptn_ref[...] = jnp.zeros_like(ptn_ref)
            pt_ref[...] = jnp.zeros_like(pt_ref)

        tgt_ref[...] += tgt_tile
        ptn_ref[...] += ptn_tile
        pt_ref[...] += pt_tile
        m_new = jnp.maximum(m_ref[...], m_tile)
        l_ref[...] = (l_ref[...] * jnp.exp(m_ref[...] - m_new)
                      + jnp.sum(jnp.exp(sc - m_new), axis=1, keepdims=True))
        m_ref[...] = m_new


# ----------------------------------------------------------------------------
# Tile / split selection with honest VMEM accounting
# ----------------------------------------------------------------------------
def _choose_tile_c(C, D, stream_itemsize):
    if C * D * 4 <= (2 << 20):        # tiny proxy matrix: collapse to one step
        return C
    # per streamed class row: 3 pipelined proxy buffers + ~2 f32 passes of
    # squared-norm temporaries (conservative)
    per_row = (3 * stream_itemsize + 8) * D
    budget = 16 * 1024 * 1024          # well under default scoped VMEM, v7x-safe
    for cand in (2048, 1024, 512, 256, 128):
        if cand * per_row <= budget and C >= 4 * cand:   # keep >= 4 tiles streaming
            return cand
    return 128


def mp_fused(x_pos, anchor, proxies, T, w, *, lambda_=0.5, tile_c=None,
             n_splits=None):
    B, D = x_pos.shape
    C, D2 = proxies.shape
    assert D == D2

    if proxies.dtype not in (jnp.bfloat16, jnp.float32):
        proxies = proxies.astype(jnp.float32)
    stream_bytes = proxies.dtype.itemsize

    if tile_c is None:
        tile_c = _choose_tile_c(C, D, stream_bytes)
    tile_c = int(tile_c)
    if tile_c < C:
        tile_c = _cdiv(tile_c, 8) * 8          # (8, 128) sublane alignment

    n_tiles_real = _cdiv(C, tile_c)
    if n_splits is None:
        # v7x: split the class stream across both TensorCores when it is long.
        n_splits = 2 if n_tiles_real >= 8 else 1
    n_splits = max(1, min(int(n_splits), n_tiles_real))
    n_inner = _cdiv(n_tiles_real, n_splits)
    n_splits = _cdiv(n_tiles_real, n_inner)    # no fully-padded split
    c_padded = n_splits * n_inner * tile_c

    if c_padded != C:
        # TODO(synk): for training loops keep the proxies stored pre-padded
        # (and in bf16) so this pad does not re-stream the matrix every step.
        proxies = jnp.pad(proxies, ((0, c_padded - C), (0, 0)))

    x_bf = x_pos.astype(jnp.bfloat16)
    a_bf = anchor.astype(jnp.bfloat16)
    t_col = jnp.asarray(T).reshape(B, 1).astype(jnp.int32)
    w = jnp.asarray(w)
    w_smem = jnp.reshape(w.astype(jnp.float32), (1, 1))

    kernel = functools.partial(_mp_partial_kernel, n_inner=n_inner,
                               n_classes=C, c_padded=c_padded)

    prox_kwargs = {}
    if n_inner >= 4:                 # long stream: triple-buffer the only DMA
        prox_kwargs["pipeline_mode"] = pl.Buffered(3)
    prox_spec = pl.BlockSpec((tile_c, D),
                             lambda s, k: (s * n_inner + k, 0), **prox_kwargs)

    def small_spec():
        return pl.BlockSpec((None, B, 1), lambda s, k: (s, 0, 0))

    out_specs = (small_spec(), small_spec(), small_spec(), small_spec(),
                 pl.BlockSpec((None, B, D), lambda s, k: (s, 0, 0)))
    out_shape = tuple(jax.ShapeDtypeStruct((n_splits, B, 1), jnp.float32)
                      for _ in range(4)) + (
        jax.ShapeDtypeStruct((n_splits, B, D), jnp.float32),)

    # honest VMEM footprint (+headroom) -> explicit compiler limit
    n_buf = 3 if n_inner >= 4 else 2
    est = (n_buf * tile_c * D * stream_bytes      # pipelined proxy buffers
           + 2 * tile_c * D * 4                   # f32 norm temporaries
           + 6 * B * tile_c * 4                   # score-sized temporaries
           + 4 * B * D * 8                        # resident x/anchor + pt blocks
           + (2 << 20))
    vmem_limit = int(min(max(32 * 1024 * 1024, est * 5 // 4), 96 * 1024 * 1024))

    m, l, tgt, ptn, pt = pl.pallas_call(
        kernel,
        out_shape=out_shape,
        grid_spec=pltpu.PrefetchScalarGridSpec(
            num_scalar_prefetch=0,
            grid=(n_splits, n_inner),
            in_specs=[
                pl.BlockSpec((B, 1), lambda s, k: (0, 0)),    # labels
                pl.BlockSpec((B, D), lambda s, k: (0, 0)),    # out_positive bf16
                pl.BlockSpec((B, D), lambda s, k: (0, 0)),    # out_anchor bf16
                prox_spec,                                    # proxies (streamed)
                pl.BlockSpec((1, 1), lambda s, k: (0, 0),
                             memory_space=pltpu.MemorySpace.SMEM),  # w
            ],
            out_specs=out_specs,
            scratch_shapes=[pltpu.VMEM((B, B), jnp.float32)],  # s_anchor
        ),
        compiler_params=pltpu.CompilerParams(
            dimension_semantics=("parallel", "arbitrary"),
            vmem_limit_bytes=vmem_limit),
    )(t_col, x_bf, a_bf, proxies, w_smem)

    # ---- tiny plain-JAX epilogue: merge split partials, loss2, accuracy ----
    m_g = jnp.max(m, axis=0)                              # (B, 1)
    l_g = jnp.sum(l * jnp.exp(m - m_g), axis=0)
    tgt_g = jnp.sum(tgt, axis=0)
    pt_g = jnp.sum(pt, axis=0) * jnp.sum(ptn, axis=0)     # normalized P[T] (B, D)
    loss1 = m_g + jnp.log(l_g) - tgt_g                    # -log_softmax at target

    w_f = w.astype(jnp.float32)
    s2 = jnp.dot(a_bf, pt_g.astype(jnp.bfloat16).T,
                 preferred_element_type=jnp.float32) * w_f  # (B, B); b cancels
    labels = jnp.arange(B)
    loss2 = -jax.nn.log_softmax(s2, axis=-1)[labels, labels]
    prec1 = 100.0 * jnp.mean((jnp.argmax(s2, axis=1) == labels)
                             .astype(jnp.float32))
    loss = jnp.mean(loss1) + jnp.float32(lambda_) * jnp.mean(loss2)
    return loss, prec1


# ----------------------------------------------------------------------------
# Parameter init + forward (glue in plain JAX)
# ----------------------------------------------------------------------------
def init_mp_params(key, n_classes, n_out, w_init=10.0, b_init=-5.0):
    # kaiming_normal_(mode='fan_out') on (n_classes, n_out): fan_out = n_classes
    std = (2.0 / n_classes) ** 0.5
    proxies = jax.random.normal(key, (n_classes, n_out), jnp.float32) * std
    # NOTE: for peak bandwidth, keep/maintain a bf16 copy of `proxies` for the
    # forward stream (the kernel accepts either f32 or bf16).
    return dict(proxies=proxies,
                w=jnp.array(w_init, jnp.float32),
                b=jnp.array(b_init, jnp.float32),    # cancels in CE; unused
                w2=jnp.array(w_init, jnp.float32),   # unused in forward (as torch)
                b2=jnp.array(b_init, jnp.float32))


def mp_forward(params, X, T, *, lambda_=0.5, tile_c=None, n_splits=None):
    # TODO(synk): pre_process() is not defined in the module source; assume the
    # standard split: query = X[:, 0], centroid = mean(X[:, 1:]), new_label = T
    # (labels unique within the batch, as in speaker-verification training).
    out_positive = X[:, 0, :]                       # (B, D)
    out_anchor = jnp.mean(X[:, 1:, :], axis=1)      # (B, D)
    return mp_fused(out_positive, out_anchor, params["proxies"],
                    jnp.asarray(T), params["w"],
                    lambda_=lambda_, tile_c=tile_c, n_splits=n_splits)


def mp_forward_ref(params, X, T, *, lambda_=0.5):
    """Pure-JAX reference mirroring the kernel numerics (bf16 MXU operands,
    normalization folded as a per-column scale, f32 anchor-score columns)."""
    out_positive = X[:, 0, :]
    out_anchor = jnp.mean(X[:, 1:, :], axis=1)
    T = jnp.asarray(T).astype(jnp.int32)
    B = out_positive.shape[0]
    proxies = params["proxies"]
    w = params["w"].astype(jnp.float32)

    p32 = proxies.astype(jnp.float32)
    inv_n = jax.lax.rsqrt(
        jnp.maximum(jnp.sum(p32 * p32, axis=1, keepdims=True), 1e-24))  # (C,1)
    x_bf = out_positive.astype(jnp.bfloat16)
    a_bf = out_anchor.astype(jnp.bfloat16)
    p_bf = proxies.astype(jnp.bfloat16)

    s = jnp.dot(x_bf, p_bf.T, preferred_element_type=jnp.float32) * inv_n.T
    s_anchor = jnp.dot(x_bf, a_bf.T, preferred_element_type=jnp.float32)
    s = s.at[:, T].set(s_anchor)                    # new_center[T] = out_anchor
    s = s * w                                       # bias b cancels
    loss1 = -jnp.take_along_axis(jax.nn.log_softmax(s, axis=-1),
                                 T[:, None], axis=1)[:, 0]

    PT = p_bf.astype(jnp.float32)[T] * inv_n[T]
    s2 = jnp.dot(a_bf, PT.astype(jnp.bfloat16).T,
                 preferred_element_type=jnp.float32) * w
    labels = jnp.arange(B)
    loss2 = -jax.nn.log_softmax(s2, axis=-1)[labels, labels]
    prec1 = 100.0 * jnp.mean((jnp.argmax(s2, axis=1) == labels)
                             .astype(jnp.float32))
    return loss1.mean() + lambda_ * loss2.mean(), prec1


if __name__ == "__main__":
    key = jax.random.PRNGKey(0)
    k_params, k_x, k_t = jax.random.split(key, 3)

    B, M, D, C = 8, 3, 128, 512      # speakers, utts/speaker, embed, classes
    params = init_mp_params(k_params, C, D)                       # f32 proxies
    params_bf = dict(params, proxies=params["proxies"].astype(jnp.bfloat16))

    X = jax.random.normal(k_x, (B, M, D), jnp.float32)
    X = X / jnp.linalg.norm(X, axis=-1, keepdims=True)
    T = jax.random.permutation(k_t, C)[:B]                        # unique labels

    fwd_auto = jax.jit(functools.partial(mp_forward, lambda_=0.5))
    fwd_tiled = jax.jit(functools.partial(mp_forward, lambda_=0.5, tile_c=128))
    fwd_split = jax.jit(functools.partial(mp_forward, lambda_=0.5, tile_c=128,
                                          n_splits=2))
    fwd_padded = jax.jit(functools.partial(mp_forward, lambda_=0.5, tile_c=384))
    ref = jax.jit(functools.partial(mp_forward_ref, lambda_=0.5))

    out = {
        "auto_bf16":   fwd_auto(params_bf, X, T),    # collapsed single tile
        "tiled_bf16":  fwd_tiled(params_bf, X, T),   # 4 tiles, Buffered(3) stream
        "split_bf16":  fwd_split(params_bf, X, T),   # 2-way parallel class split
        "padded_bf16": fwd_padded(params_bf, X, T),  # padded C + column mask
        "auto_f32":    fwd_auto(params, X, T),       # f32-streamed proxies
        "ref_bf16":    ref(params_bf, X, T),
        "ref_f32":     ref(params, X, T),
    }
    jax.block_until_ready(out)

    loss0, prec0 = float(out["auto_bf16"][0]), float(out["auto_bf16"][1])
    for name in ("tiled_bf16", "split_bf16", "padded_bf16", "ref_bf16"):
        l_, p_ = float(out[name][0]), float(out[name][1])
        assert np.allclose(loss0, l_, rtol=1e-3, atol=2e-3), (name, loss0, l_)
        assert np.allclose(prec0, p_, atol=1e-3), (name, prec0, p_)
    # f32-streamed path matches its own (f32-norm) reference ...
    assert np.allclose(float(out["auto_f32"][0]), float(out["ref_f32"][0]),
                       rtol=1e-3, atol=2e-3)
    # ... and stays close to the bf16-streamed path
    assert np.allclose(float(out["auto_f32"][0]), loss0, rtol=1e-2, atol=3e-2)

    print("KERNEL_OK")
</pallas_src>

<mosaic_0001>
module attributes {stable_mosaic.version = 11 : i64} {
  func.func @_mp_partial_kernel(%arg0: i32, %arg1: i32, %arg2: memref<8x1xi32, #tpu.memory_space<vmem>>, %arg3: memref<8x128xbf16, #tpu.memory_space<vmem>>, %arg4: memref<8x128xbf16, #tpu.memory_space<vmem>>, %arg5: memref<512x128xbf16, #tpu.memory_space<vmem>>, %arg6: memref<1x1xf32, #tpu.memory_space<smem>>, %arg7: memref<1x8x1xf32, #tpu.memory_space<vmem>>, %arg8: memref<1x8x1xf32, #tpu.memory_space<vmem>>, %arg9: memref<1x8x1xf32, #tpu.memory_space<vmem>>, %arg10: memref<1x8x1xf32, #tpu.memory_space<vmem>>, %arg11: memref<1x8x128xf32, #tpu.memory_space<vmem>>, %arg12: memref<8x8xf32, #tpu.memory_space<vmem>>) attributes {dimension_semantics = [#tpu.dimension_semantics<parallel>, #tpu.dimension_semantics<arbitrary>], iteration_bounds = array<i64: 1, 1>, scalar_prefetch = 0 : i64, scratch_operands = 1 : i64, tpu.core_type = #tpu.core_type<tc>, window_params = [{pipeline_mode = #tpu.pipeline_mode<synchronous>, transform_indices = @transform_0, window_bounds = array<i64: 8, 1>}, {pipeline_mode = #tpu.pipeline_mode<synchronous>, transform_indices = @transform_1, window_bounds = array<i64: 8, 128>}, {pipeline_mode = #tpu.pipeline_mode<synchronous>, transform_indices = @transform_2, window_bounds = array<i64: 8, 128>}, {transform_indices = @transform_3, window_bounds = array<i64: 512, 128>}, {transform_indices = @transform_4, window_bounds = array<i64: 1, 1>}, {transform_indices = @transform_5, window_bounds = array<i64: 1, 8, 1>}, {transform_indices = @transform_6, window_bounds = array<i64: 1, 8, 1>}, {transform_indices = @transform_7, window_bounds = array<i64: 1, 8, 1>}, {transform_indices = @transform_8, window_bounds = array<i64: 1, 8, 1>}, {transform_indices = @transform_9, window_bounds = array<i64: 1, 8, 128>}]} {
    %c1_i32 = arith.constant 1 : i32
    %0 = arith.muli %arg0, %c1_i32 : i32
    %1 = arith.addi %0, %arg1 : i32
    %c512_i32 = arith.constant 512 : i32
    %2 = arith.muli %1, %c512_i32 : i32
    %c0 = arith.constant 0 : index
    %c0_0 = arith.constant 0 : index
    %3 = memref.load %arg6[%c0, %c0_0] : memref<1x1xf32, #tpu.memory_space<smem>>
    %c0_1 = arith.constant 0 : index
    %c0_2 = arith.constant 0 : index
    %4 = vector.load %arg3[%c0_1, %c0_2] : memref<8x128xbf16, #tpu.memory_space<vmem>>, vector<8x128xbf16>
    %c0_3 = arith.constant 0 : index
    %c0_4 = arith.constant 0 : index
    %5 = vector.load %arg4[%c0_3, %c0_4] : memref<8x128xbf16, #tpu.memory_space<vmem>>, vector<8x128xbf16>
    %c0_i32 = arith.constant 0 : i32
    %6 = arith.cmpi eq, %arg1, %c0_i32 : i32
    %7 = arith.extui %6 : i1 to i32
    %c0_i32_5 = arith.constant 0 : i32
    %8 = arith.cmpi ne, %7, %c0_i32_5 : i32
    scf.if %8 {
      %cst_40 = arith.constant dense<0.000000e+00> : vector<8x8xf32>
      %75 = tpu.matmul %4, %5, %cst_40 {dimension_numbers = #tpu.dot_dimension_numbers<[1], [1], [0], [0], [0, 0, 1, 0], [], []>} : vector<8x128xbf16>, vector<8x128xbf16>, vector<8x8xf32> -> vector<8x8xf32>
      %c0_41 = arith.constant 0 : index
      %c0_42 = arith.constant 0 : index
      %76 = vector.load %arg12[%c0_41, %c0_42] : memref<8x8xf32, #tpu.memory_space<vmem>>, vector<8x8xf32>
      tpu.vector_store %arg12[%c0_41, %c0_42], %75 {strides = array<i32>} : memref<8x8xf32, #tpu.memory_space<vmem>>, vector<8x8xf32>,
    } else {
    }
    %c0_6 = arith.constant 0 : index
    %c0_7 = arith.constant 0 : index
    %9 = vector.load %arg5[%c0_6, %c0_7] : memref<512x128xbf16, #tpu.memory_space<vmem>>, vector<512x128xbf16>
    %10 = arith.extf %9 : vector<512x128xbf16> to vector<512x128xf32>
    %cst = arith.constant 1.000000e+00 : f32
    %11 = vector.broadcast %cst : f32 to vector<1x128xf32>
    %12 = arith.mulf %10, %10 : vector<512x128xf32>
    %cst_8 = arith.constant dense<0.000000e+00> : vector<1x512xf32>
    %13 = tpu.matmul %11, %12, %cst_8 {dimension_numbers = #tpu.dot_dimension_numbers<[1], [1], [0], [0], [0, 0, 1, 0], [], []>} : vector<1x128xf32>, vector<512x128xf32>, vector<1x512xf32> -> vector<1x512xf32>
    %cst_9 = arith.constant 1.000000e-24 : f32
    %14 = vector.broadcast %cst_9 : f32 to vector<1x512xf32>
    %15 = arith.maximumf %13, %14 : vector<1x512xf32>
    %16 = math.rsqrt %15 : vector<1x512xf32>
    %17 = tpu.iota {dimensions = array<i32: 1>} : vector<8x512xi32>
    %18 = vector.broadcast %2 : i32 to vector<8x512xi32>
    %19 = arith.addi %17, %18 : vector<8x512xi32>
    %c0_10 = arith.constant 0 : index
    %c0_11 = arith.constant 0 : index
    %20 = vector.load %arg2[%c0_10, %c0_11] : memref<8x1xi32, #tpu.memory_space<vmem>>, vector<8x1xi32>
    %21 = vector.broadcast %20 : vector<8x1xi32> to vector<8x512xi32>
    %22 = arith.cmpi eq, %19, %21 : vector<8x512xi32>
    %23 = arith.extui %22 : vector<8x512xi1> to vector<8x512xi32>
    %24 = arith.sitofp %23 : vector<8x512xi32> to vector<8x512xf32>
    %cst_12 = arith.constant dense<0.000000e+00> : vector<8x512xf32>
    %25 = tpu.matmul %4, %9, %cst_12 {dimension_numbers = #tpu.dot_dimension_numbers<[1], [1], [0], [0], [0, 0, 1, 0], [], []>} : vector<8x128xbf16>, vector<512x128xbf16>, vector<8x512xf32> -> vector<8x512xf32>
    %c0_13 = arith.constant 0 : index
    %c0_14 = arith.constant 0 : index
    %26 = vector.load %arg12[%c0_13, %c0_14] : memref<8x8xf32, #tpu.memory_space<vmem>>, vector<8x8xf32>
    %cst_15 = arith.constant dense<0.000000e+00> : vector<8x512xf32>
    %27 = tpu.matmul %26, %24, %cst_15 {dimension_numbers = #tpu.dot_dimension_numbers<[1], [0], [0], [1], [0, 0, 1, 1], [], []>} : vector<8x8xf32>, vector<8x512xf32>, vector<8x512xf32> -> vector<8x512xf32>
    %cst_16 = arith.constant dense<0.000000e+00> : vector<512xf32>
    %28 = vector.multi_reduction <add>, %24, %cst_16 [0] : vector<8x512xf32> to vector<512xf32>
    %29 = vector.shape_cast %28 : vector<512xf32> to vector<1x512xf32>
    %cst_17 = arith.constant 0.000000e+00 : f32
    %30 = vector.broadcast %cst_17 : f32 to vector<1x512xf32>
    %31 = arith.cmpf ogt, %29, %30 : vector<1x512xf32>
    %32 = vector.broadcast %16 : vector<1x512xf32> to vector<8x512xf32>
    %33 = arith.mulf %25, %32 : vector<8x512xf32>
    %34 = vector.shape_cast %31 : vector<1x512xi1> to vector<1x512xi1>
    %35 = vector.broadcast %34 : vector<1x512xi1> to vector<8x512xi1>
    %36 = arith.select %35, %27, %33 : vector<8x512xi1>, vector<8x512xf32>
    %37 = vector.broadcast %3 : f32 to vector<8x512xf32>
    %38 = arith.mulf %36, %37 : vector<8x512xf32>
    %cst_18 = arith.constant 0.000000e+00 : f32
    %39 = vector.broadcast %cst_18 : f32 to vector<8x512xf32>
    %40 = arith.select %22, %38, %39 : vector<8x512xi1>, vector<8x512xf32>
    %cst_19 = arith.constant dense<0.000000e+00> : vector<8xf32>
    %41 = vector.multi_reduction <add>, %40, %cst_19 [1] : vector<8x512xf32> to vector<8xf32>
    %42 = vector.shape_cast %41 : vector<8xf32> to vector<8x1xf32>
    %cst_20 = arith.constant 0.000000e+00 : f32
    %43 = vector.shape_cast %16 : vector<1x512xf32> to vector<1x512xf32>
    %44 = vector.broadcast %43 : vector<1x512xf32> to vector<8x512xf32>
    %45 = vector.broadcast %cst_20 : f32 to vector<8x512xf32>
    %46 = arith.select %22, %44, %45 : vector<8x512xi1>, vector<8x512xf32>
    %cst_21 = arith.constant dense<0.000000e+00> : vector<8xf32>
    %47 = vector.multi_reduction <add>, %46, %cst_21 [1] : vector<8x512xf32> to vector<8xf32>
    %48 = vector.shape_cast %47 : vector<8xf32> to vector<8x1xf32>
    %49 = arith.extui %22 : vector<8x512xi1> to vector<8x512xi32>
    %50 = arith.sitofp %49 : vector<8x512xi32> to vector<8x512xf32>
    %51 = arith.truncf %50 : vector<8x512xf32> to vector<8x512xbf16>
    %cst_22 = arith.constant dense<0.000000e+00> : vector<8x128xf32>
    %52 = tpu.matmul %51, %9, %cst_22 {dimension_numbers = #tpu.dot_dimension_numbers<[1], [0], [0], [1], [0, 0, 1, 1], [], []>} : vector<8x512xbf16>, vector<512x128xbf16>, vector<8x128xf32> -> vector<8x128xf32>
    %cst_23 = arith.constant dense<0xFF800000> : vector<8xf32>
    %53 = vector.multi_reduction <maximumf>, %38, %cst_23 [1] : vector<8x512xf32> to vector<8xf32>
    %54 = vector.shape_cast %53 : vector<8xf32> to vector<8x1xf32>
    %c0_24 = arith.constant 0 : index
    %c0_25 = arith.constant 0 : index
    %c0_26 = arith.constant 0 : index
    %55 = vector.load %arg7[%c0_24, %c0_25, %c0_26] : memref<1x8x1xf32, #tpu.memory_space<vmem>>, vector<1x8x1xf32>
    %56 = vector.shape_cast %55 : vector<1x8x1xf32> to vector<8x1xf32>
    %57 = vector.shape_cast %54 : vector<8x1xf32> to vector<1x8x1xf32>
    tpu.vector_store %arg7[%c0_24, %c0_25, %c0_26], %57 {strides = array<i32>} : memref<1x8x1xf32, #tpu.memory_space<vmem>>, vector<1x8x1xf32>,
    %58 = vector.broadcast %54 : vector<8x1xf32> to vector<8x512xf32>
    %59 = arith.subf %38, %58 : vector<8x512xf32>
    %60 = math.exp %59 : vector<8x512xf32>
    %cst_27 = arith.constant dense<0.000000e+00> : vector<8xf32>
    %61 = vector.multi_reduction <add>, %60, %cst_27 [1] : vector<8x512xf32> to vector<8xf32>
    %62 = vector.shape_cast %61 : vector<8xf32> to vector<8x1xf32>
    %c0_28 = arith.constant 0 : index
    %c0_29 = arith.constant 0 : index
    %c0_30 = arith.constant 0 : index
    %63 = vector.load %arg8[%c0_28, %c0_29, %c0_30] : memref<1x8x1xf32, #tpu.memory_space<vmem>>, vector<1x8x1xf32>
    %64 = vector.shape_cast %63 : vector<1x8x1xf32> to vector<8x1xf32>
    %65 = vector.shape_cast %62 : vector<8x1xf32> to vector<1x8x1xf32>
    tpu.vector_store %arg8[%c0_28, %c0_29, %c0_30], %65 {strides = array<i32>} : memref<1x8x1xf32, #tpu.memory_space<vmem>>, vector<1x8x1xf32>,
    %c0_31 = arith.constant 0 : index
    %c0_32 = arith.constant 0 : index
    %c0_33 = arith.constant 0 : index
    %66 = vector.load %arg9[%c0_31, %c0_32, %c0_33] : memref<1x8x1xf32, #tpu.memory_space<vmem>>, vector<1x8x1xf32>
    %67 = vector.shape_cast %66 : vector<1x8x1xf32> to vector<8x1xf32>
    %68 = vector.shape_cast %42 : vector<8x1xf32> to vector<1x8x1xf32>
    tpu.vector_store %arg9[%c0_31, %c0_32, %c0_33], %68 {strides = array<i32>} : memref<1x8x1xf32, #tpu.memory_space<vmem>>, vector<1x8x1xf32>,
    %c0_34 = arith.constant 0 : index
    %c0_35 = arith.constant 0 : index
    %c0_36 = arith.constant 0 : index
    %69 = vector.load %arg10[%c0_34, %c0_35, %c0_36] : memref<1x8x1xf32, #tpu.memory_space<vmem>>, vector<1x8x1xf32>
    %70 = vector.shape_cast %69 : vector<1x8x1xf32> to vector<8x1xf32>
    %71 = vector.shape_cast %48 : vector<8x1xf32> to vector<1x8x1xf32>
    tpu.vector_store %arg10[%c0_34, %c0_35, %c0_36], %71 {strides = array<i32>} : memref<1x8x1xf32, #tpu.memory_space<vmem>>, vector<1x8x1xf32>,
    %c0_37 = arith.constant 0 : index
    %c0_38 = arith.constant 0 : index
    %c0_39 = arith.constant 0 : index
    %72 = vector.load %arg11[%c0_37, %c0_38, %c0_39] : memref<1x8x128xf32, #tpu.memory_space<vmem>>, vector<1x8x128xf32>
    %73 = vector.shape_cast %72 : vector<1x8x128xf32> to vector<8x128xf32>
    %74 = vector.shape_cast %52 : vector<8x128xf32> to vector<1x8x128xf32>
    tpu.vector_store %arg11[%c0_37, %c0_38, %c0_39], %74 {strides = array<i32>} : memref<1x8x128xf32, #tpu.memory_space<vmem>>, vector<1x8x128xf32>,
    return
  }
  func.func @transform_0(%arg0: i32, %arg1: i32) -> (i32, i32) {
    %c0_i32 = arith.constant 0 : i32
    %c0_i32_0 = arith.constant 0 : i32
    %c0_i32_1 = arith.constant 0 : i32
    return %c0_i32, %c0_i32_0 : i32, i32
  }
  func.func @transform_1(%arg0: i32, %arg1: i32) -> (i32, i32) {
    %c0_i32 = arith.constant 0 : i32
    %c0_i32_0 = arith.constant 0 : i32
    %c0_i32_1 = arith.constant 0 : i32
    return %c0_i32, %c0_i32_0 : i32, i32
  }
  func.func @transform_2(%arg0: i32, %arg1: i32) -> (i32, i32) {
    %c0_i32 = arith.constant 0 : i32
    %c0_i32_0 = arith.constant 0 : i32
    %c0_i32_1 = arith.constant 0 : i32
    return %c0_i32, %c0_i32_0 : i32, i32
  }
  func.func @transform_3(%arg0: i32, %arg1: i32) -> (i32, i32) {
    %c1_i32 = arith.constant 1 : i32
    %0 = arith.muli %arg0, %c1_i32 : i32
    %1 = arith.addi %0, %arg1 : i32
    %c0_i32 = arith.constant 0 : i32
    %c0_i32_0 = arith.constant 0 : i32
    return %1, %c0_i32 : i32, i32
  }
  func.func @transform_4(%arg0: i32, %arg1: i32) -> (i32, i32) {
    %c0_i32 = arith.constant 0 : i32
    %c0_i32_0 = arith.constant 0 : i32
    %c0_i32_1 = arith.constant 0 : i32
    return %c0_i32, %c0_i32_0 : i32, i32
  }
  func.func @transform_5(%arg0: i32, %arg1: i32) -> (i32, i32, i32) {
    %c0_i32 = arith.constant 0 : i32
    %c0_i32_0 = arith.constant 0 : i32
    %c0_i32_1 = arith.constant 0 : i32
    return %arg0, %c0_i32, %c0_i32_0 : i32, i32, i32
  }
  func.func @transform_6(%arg0: i32, %arg1: i32) -> (i32, i32, i32) {
    %c0_i32 = arith.constant 0 : i32
    %c0_i32_0 = arith.constant 0 : i32
    %c0_i32_1 = arith.constant 0 : i32
    return %arg0, %c0_i32, %c0_i32_0 : i32, i32, i32
  }
  func.func @transform_7(%arg0: i32, %arg1: i32) -> (i32, i32, i32) {
    %c0_i32 = arith.constant 0 : i32
    %c0_i32_0 = arith.constant 0 : i32
    %c0_i32_1 = arith.constant 0 : i32
    return %arg0, %c0_i32, %c0_i32_0 : i32, i32, i32
  }
  func.func @transform_8(%arg0: i32, %arg1: i32) -> (i32, i32, i32) {
    %c0_i32 = arith.constant 0 : i32
    %c0_i32_0 = arith.constant 0 : i32
    %c0_i32_1 = arith.constant 0 : i32
    return %arg0, %c0_i32, %c0_i32_0 : i32, i32, i32
  }
  func.func @transform_9(%arg0: i32, %arg1: i32) -> (i32, i32, i32) {
    %c0_i32 = arith.constant 0 : i32
    %c0_i32_0 = arith.constant 0 : i32
    %c0_i32_1 = arith.constant 0 : i32
    return %arg0, %c0_i32, %c0_i32_0 : i32, i32, i32
  }
}

</mosaic_0001>

<bundles_post_ra>
// kernel: mp_forward.1
= control target key start
LH: loop header
LB: loop body
LE: loop exit
PB: predicated region body
PF: predicated region fallthrough
CT: control target
= control target key end

     0   :  { %16 = vsyncpa [#allocation5], 0  ;;  %s1486_s30 = smov [#allocation4]   ;;  %s1867_s0 = inlined_call_operand.vmem [shape: s32[8,1], index: 0, kind: input, shape index: {}]   ;;  %s1868_s1 = inlined_call_operand.vmem [shape: bf16[8,128], index: 1, kind: input, shape index: {}]   ;;  %s1869_s2 = inlined_call_operand.vmem [shape: bf16[8,128], index: 2, kind: input, shape index: {}]   ;;  %s1870_s3 = inlined_call_operand.hbm [shape: bf16[512,128], index: 3, kind: input, shape index: {}]   ;;  %s1871_s4 = inlined_call_operand.<no memory space> [shape: f32[1,1], index: 4, kind: input, shape index: {}]   ;;  %s1872_s5 = inlined_call_operand.vmem [shape: f32[1,8,1], index: 5, kind: output, shape index: {0}]   ;;  %s1873_s6 = inlined_call_operand.vmem [shape: f32[1,8,1], index: 6, kind: output, shape index: {1}]   ;;  %s1874_s7 = inlined_call_operand.vmem [shape: f32[1,8,1], index: 7, kind: output, shape index: {2}]   ;;  %s1875_s8 = inlined_call_operand.vmem [shape: f32[1,8,1], index: 8, kind: output, shape index: {3}]   ;;  %s1876_s9 = inlined_call_operand.vmem [shape: f32[1,8,128], index: 9, kind: output, shape index: {4}]  }
   0x1   :  { %s32_s10 = sshll.u32 %s1486_s30, 4  ;;  %s1462_s13 = scalar_lea.hbm %s1870_s3, 4096  ;;  %s33_s10 = int_to_ptr.vmem [resolvable:$true] %s32_s10 }
   0x2   :  { %p1463_p0 = scmp.ne.s32.totalorder %s1870_s3, %s1462_s13  ;;  %p1466_p1 = scmp.lt.u32.totalorder %s1462_s13, %s1870_s3 }
   0x4   :  { %p1468_p2 = pnand %p1466_p1, %p1463_p0 }
   0x6   :  { %1471 = shalt.err (!%p1468_p2)
}
   0x7   :  { %s1472_s18 = scalar_lea.vmem %s33_s10, 4096  ;;  %p1477_p4 = scmp.lt.s32.totalorder %s33_s10, %s33_s10 }
   0x8   :  { %p1473_p3 = scmp.ne.s32.totalorder %s33_s10, %s1472_s18  ;;  %p1478_p5 = scmp.lt.s32.totalorder %s1472_s18, %s1472_s18 }
   0xa   :  { %p1479_p6 = por %p1478_p5, %p1477_p4 }
   0xc   :  { %p1480_p7 = pnand %p1479_p6, %p1473_p3 }
   0xe   :  { %1483 = shalt.err (!%p1480_p7)
}
   0xf   :  { %s1487_s19 = smov 64   ;;  %s1488_s20 = smov 4  }
  0x10   :  { %38 = dma.hbm_to_vmem [thread:$0]  %s1870_s3, 4096, %s33_s10, [#allocation5], %s1487_s19, %s1487_s19, %s1488_s20  }
  0x11   :  { %1484 = dma.done.wait [#allocation5], 4096  }
  0x12   :  { %1485 = vsyncadd [#allocation5], 4294963200  ;;  %v1489_v0 = vmov 0.0   ;;  %vm1490_vm0 = vmmov 0   ;;  %v1491_v1 = vmov 1.0   ;;  %v1492_v2 = vmov 0  }
  0x13   :  { %1303 = vmatprep.subr.bf16.mxu0 %v1489_v0  ;;  %1305 = vmatprep.mubr.msk.bf16.mxu0 %vm1490_vm0, %v1489_v0  ;;  %v51_v3 = vld [vmem:[%s1869_s2] sm:$0xf]  ;;  %v1562_v4 = vld [vmem:[#allocation4 + $0x40] sm:$0xff]   ;;  %v1575_v13 = vld [vmem:[#allocation4 + $0x48] sm:$0xff]   ;;  %vm96_vm6 = vcmask 64512   ;;  %vm1059_vm14 = vcmask 7168  }
  0x14   :  { %1187 = vmatprep.mubr.f32.mxu1 %v1491_v1  ;;  %1381 = vset.pattern.permute.xlu0 %v1492_v2  ;;  %v178_v5 = vunpack.c.l.bf16 %v1562_v4  ;;  %v179_v6 = vunpack.c.h.bf16 %v1562_v4  ;;  %v1566_v7 = vld [vmem:[#allocation4] sm:$0xff]   ;;  %v1579_v18 = vld [vmem:[#allocation4 + $0x8] sm:$0xff]   ;;  %v1587_v25 = vld [vmem:[%s1868_s1] sm:$0xf]  ;;  %v180_v28 = vunpack.c.l.bf16 %v1575_v13  ;;  %v181_v31 = vunpack.c.h.bf16 %v1575_v13 }
  0x15   :  { %1304 = vmatpush3.bf16.xpose.msra.mxu0 %v51_v3  ;;  %v1568_v8 = vld [vmem:[#allocation4 + $0xc0] sm:$0xff]   ;;  %v162_v10 = vunpack.c.l.bf16 %v1566_v7  ;;  %v163_v11 = vunpack.c.h.bf16 %v1566_v7  ;;  %v1582_v23 = vld [vmem:[#allocation4 + $0xc8] sm:$0xff]   ;;  %v164_v32 = vunpack.c.l.bf16 %v1579_v18  ;;  %v165_v36 = vunpack.c.h.bf16 %v1579_v18  ;;  %v1596_v38 = vld [vmem:[#allocation4 + $0x50] sm:$0xff]  }
  0x16   :  { %v1570_v9 = vld [vmem:[#allocation4 + $0x80] sm:$0xff]   ;;  %v210_v12 = vunpack.c.l.bf16 %v1568_v8  ;;  %v242_v14 = vmul.f32 %v178_v5, %v178_v5  ;;  %v243_v15 = vmul.f32 %v179_v6, %v179_v6  ;;  %v211_v16 = vunpack.c.h.bf16 %v1568_v8  ;;  %v1592_v33 = vld [vmem:[#allocation4 + $0x88] sm:$0xff]   ;;  %v1600_v43 = vld [vmem:[#allocation4 + $0x10] sm:$0xff]  }
  0x17   :  { %v194_v17 = vunpack.c.l.bf16 %v1570_v9  ;;  %v226_v19 = vmul.f32 %v162_v10, %v162_v10  ;;  %v227_v20 = vmul.f32 %v163_v11, %v163_v11  ;;  %v195_v22 = vunpack.c.h.bf16 %v1570_v9  ;;  %v1607_v52 = vld [vmem:[#allocation4 + $0xd0] sm:$0xff]   ;;  %v450_v58 = vld [vmem:[%s1867_s0] sm:$0xff] }
  0x18   :  { %v274_v21 = vmul.f32 %v210_v12, %v210_v12  ;;  %v1309_v24 = vpack.c.bf16 %v243_v15, %v242_v14  ;;  %v275_v26 = vmul.f32 %v211_v16, %v211_v16  ;;  %v244_v35 = vmul.f32 %v180_v28, %v180_v28  ;;  %v1610_v57 = vld [vmem:[#allocation4 + $0x90] sm:$0xff]   ;;  %v1616_v63 = vld [vmem:[#allocation4 + $0x58] sm:$0xff]   ;;  %452 = vperm.xlu0 %1381, %v450_v58  }
  0x19   :  { %v258_v27 = vmul.f32 %v194_v17, %v194_v17  ;;  %v1311_v29 = vpack.c.bf16 %v227_v20, %v226_v19  ;;  %v259_v30 = vmul.f32 %v195_v22, %v195_v22  ;;  %v212_v37 = vunpack.c.l.bf16 %v1582_v23  ;;  %v1624_v20 = vld [vmem:[#allocation4 + $0xd8] sm:$0xff]  }
  0x1a   :  { %1310 = vmatprep.subr.bf16.mxu1 %v1309_v24  ;;  %v1341_v34 = vpack.c.bf16 %v275_v26, %v274_v21  ;;  %v245_v40 = vmul.f32 %v181_v31, %v181_v31  ;;  %v228_v41 = vmul.f32 %v164_v32, %v164_v32  ;;  %v213_v42 = vunpack.c.h.bf16 %v1582_v23  ;;  %v1626_v26 = vld [vmem:[#allocation4 + $0x18] sm:$0xff]   ;;  %v1630_v31 = vld [vmem:[#allocation4 + $0x60] sm:$0xff]  }
  0x1b   :  { %1312 = vmatpush3.bf16.xpose.msra.mxu1 %v1311_v29  ;;  %v1343_v39 = vpack.c.bf16 %v259_v30, %v258_v27  ;;  %v229_v44 = vmul.f32 %v165_v36, %v165_v36  ;;  %v276_v45 = vmul.f32 %v212_v37, %v212_v37  ;;  %v196_v46 = vunpack.c.l.bf16 %v1592_v33 }
  0x1c   :  { %1306 = vmatmul.mubr.bf16.vlgmr.msra.gmra.mrb[0].mxu0 %v1587_v25  ;;  %1342 = vmatprep.subr.bf16.mxu0 %v1341_v34  ;;  %v197_v47 = vunpack.c.h.bf16 %v1592_v33  ;;  %v1313_v48 = vpack.c.bf16 %v245_v40, %v244_v35  ;;  %v277_v49 = vmul.f32 %v213_v42, %v213_v42  ;;  %v182_v50 = vunpack.c.l.bf16 %v1596_v38  ;;  %v1632_v34 = vld [vmem:[#allocation4 + $0x98] sm:$0xff]   ;;  %v1636_v40 = vld [vmem:[#allocation4 + $0xe0] sm:$0xff]  }
  0x1d   :  { %1221 = vmatprep.mubr.f32.mxu0 %v1491_v1  ;;  %1344 = vmatpush3.bf16.xpose.msra.mxu0 %v1343_v39  ;;  %v183_v51 = vunpack.c.h.bf16 %v1596_v38  ;;  %v1315_v53 = vpack.c.bf16 %v229_v44, %v228_v41  ;;  %v260_v54 = vmul.f32 %v196_v46, %v196_v46  ;;  %v166_v56 = vunpack.c.l.bf16 %v1600_v43 }
  0x1e   :  { %v261_v55 = vmul.f32 %v197_v47, %v197_v47  ;;  %1314 = vmatprep.subr.bf16.mxu1 %v1313_v48  ;;  %v1345_v59 = vpack.c.bf16 %v277_v49, %v276_v45  ;;  %v246_v60 = vmul.f32 %v182_v50, %v182_v50  ;;  %v167_v62 = vunpack.c.h.bf16 %v1600_v43 }
  0x1f   :  { %v247_v61 = vmul.f32 %v183_v51, %v183_v51  ;;  %v230_v3 = vmul.f32 %v166_v56, %v166_v56  ;;  %v214_v5 = vunpack.c.l.bf16 %v1607_v52  ;;  %v215_v6 = vunpack.c.h.bf16 %v1607_v52  ;;  %v1644_v56 = vld [vmem:[#allocation4 + $0x20] sm:$0xff]  }
  0x20   :  { %v1347_v2 = vpack.c.bf16 %v261_v55, %v260_v54  ;;  %1346 = vmatprep.subr.bf16.mxu0 %v1345_v59  ;;  %v231_v11 = vmul.f32 %v167_v62, %v167_v62  ;;  %v198_v12 = vunpack.c.l.bf16 %v1610_v57  ;;  %v199_v14 = vunpack.c.h.bf16 %v1610_v57 }
  0x21   :  { %v1317_v10 = vpack.c.bf16 %v247_v61, %v246_v60  ;;  %v278_v15 = vmul.f32 %v214_v5, %v214_v5  ;;  %v279_v16 = vmul.f32 %v215_v6, %v215_v6  ;;  %v184_v17 = vunpack.c.l.bf16 %v1616_v63  ;;  %v1646_v60 = vld [vmem:[#allocation4 + $0x68] sm:$0xff]  }
  0x22   :  { %v185_v19 = vunpack.c.h.bf16 %v1616_v63  ;;  %v262_v27 = vmul.f32 %v198_v12, %v198_v12  ;;  %v263_v28 = vmul.f32 %v199_v14, %v199_v14  ;;  %v216_v29 = vunpack.c.l.bf16 %v1624_v20 }
  0x23   :  { %1316 = vmatpush3.bf16.xpose.msra.mxu1 %v1315_v53  ;;  %v1349_v21 = vpack.c.bf16 %v279_v16, %v278_v15  ;;  %v248_v22 = vmul.f32 %v184_v17, %v184_v17  ;;  %v217_v30 = vunpack.c.h.bf16 %v1624_v20  ;;  %v1319_v32 = vpack.c.bf16 %v231_v11, %v230_v3 }
  0x24   :  { %1318 = vmatprep.subr.bf16.mxu1 %v1317_v10  ;;  %v249_v24 = vmul.f32 %v185_v19, %v185_v19  ;;  %v168_v35 = vunpack.c.l.bf16 %v1626_v26  ;;  %v169_v36 = vunpack.c.h.bf16 %v1626_v26  ;;  %v280_v37 = vmul.f32 %v216_v29, %v216_v29  ;;  %v1652_v10 = vld [vmem:[#allocation4 + $0xe8] sm:$0xff]  }
  0x25   :  { %1348 = vmatpush3.bf16.xpose.msra.mxu0 %v1347_v2  ;;  %v281_v39 = vmul.f32 %v217_v30, %v217_v30  ;;  %v186_v42 = vunpack.c.l.bf16 %v1630_v31  ;;  %v187_v44 = vunpack.c.h.bf16 %v1630_v31  ;;  %v1351_v45 = vpack.c.bf16 %v263_v28, %v262_v27  ;;  %v1648_v2 = vld [vmem:[#allocation4 + $0xa0] sm:$0xff]   ;;  %v1660_v30 = vld [vmem:[#allocation4 + $0x28] sm:$0xff]  }
  0x26   :  { %1350 = vmatprep.subr.bf16.mxu0 %v1349_v21  ;;  %v1321_v41 = vpack.c.bf16 %v249_v24, %v248_v22  ;;  %v200_v46 = vunpack.c.l.bf16 %v1632_v34  ;;  %v201_v47 = vunpack.c.h.bf16 %v1632_v34  ;;  %v218_v49 = vunpack.c.l.bf16 %v1636_v40 }
  0x27   :  { %v1353_v48 = vpack.c.bf16 %v281_v39, %v280_v37  ;;  %v219_v50 = vunpack.c.h.bf16 %v1636_v40  ;;  %v232_v51 = vmul.f32 %v168_v35, %v168_v35  ;;  %v233_v53 = vmul.f32 %v169_v36, %v169_v36  ;;  %v1662_v36 = vld [vmem:[#allocation4 + $0x70] sm:$0xff]  }
  0x28   :  { %v250_v54 = vmul.f32 %v186_v42, %v186_v42  ;;  %v251_v55 = vmul.f32 %v187_v44, %v187_v44  ;;  %v264_v58 = vmul.f32 %v200_v46, %v200_v46  ;;  %v265_v59 = vmul.f32 %v201_v47, %v201_v47  ;;  %v1668_v46 = vld [vmem:[#allocation4 + $0xf0] sm:$0xff]  }
  0x29   :  { %v282_v61 = vmul.f32 %v218_v49, %v218_v49  ;;  %v283_v62 = vmul.f32 %v219_v50, %v219_v50  ;;  %v1323_v3 = vpack.c.bf16 %v233_v53, %v232_v51  ;;  %v170_v5 = vunpack.c.l.bf16 %v1644_v56 }
  0x2a   :  { %v171_v6 = vunpack.c.h.bf16 %v1644_v56  ;;  %v1325_v11 = vpack.c.bf16 %v251_v55, %v250_v54  ;;  %v188_v12 = vunpack.c.l.bf16 %v1646_v60  ;;  %v189_v14 = vunpack.c.h.bf16 %v1646_v60 }
  0x2b   :  { %1320 = vmatpush3.bf16.xpose.msra.mxu1 %v1319_v32  ;;  %v1355_v15 = vpack.c.bf16 %v265_v59, %v264_v58  ;;  %v202_v16 = vunpack.c.l.bf16 %v1648_v2  ;;  %v203_v17 = vunpack.c.h.bf16 %v1648_v2  ;;  %v1357_v19 = vpack.c.bf16 %v283_v62, %v282_v61 }
  0x2c   :  { %1322 = vmatprep.subr.bf16.mxu1 %v1321_v41  ;;  %v220_v21 = vunpack.c.l.bf16 %v1652_v10  ;;  %v221_v22 = vunpack.c.h.bf16 %v1652_v10  ;;  %v234_v24 = vmul.f32 %v170_v5, %v170_v5  ;;  %v235_v27 = vmul.f32 %v171_v6, %v171_v6  ;;  %v1664_v41 = vld [vmem:[#allocation4 + $0xa8] sm:$0xff]   ;;  %v1676_v5 = vld [vmem:[#allocation4 + $0x30] sm:$0xff]  }
  0x2d   :  { %1352 = vmatpush3.bf16.xpose.msra.mxu0 %v1351_v45  ;;  %v252_v28 = vmul.f32 %v188_v12, %v188_v12  ;;  %v253_v29 = vmul.f32 %v189_v14, %v189_v14  ;;  %v266_v32 = vmul.f32 %v202_v16, %v202_v16  ;;  %v267_v35 = vmul.f32 %v203_v17, %v203_v17  ;;  %v1678_v12 = vld [vmem:[#allocation4 + $0x78] sm:$0xff]   ;;  %v1680_v16 = vld [vmem:[#allocation4 + $0xb0] sm:$0xff]  }
  0x2e   :  { %1354 = vmatprep.subr.bf16.mxu0 %v1353_v48  ;;  %v284_v37 = vmul.f32 %v220_v21, %v220_v21  ;;  %v285_v39 = vmul.f32 %v221_v22, %v221_v22  ;;  %v1327_v42 = vpack.c.bf16 %v235_v27, %v234_v24  ;;  %v172_v44 = vunpack.c.l.bf16 %v1660_v30  ;;  %v1684_v22 = vld [vmem:[#allocation4 + $0xf8] sm:$0xff]  }
  0x2f   :  { %v173_v45 = vunpack.c.h.bf16 %v1660_v30  ;;  %v1329_v47 = vpack.c.bf16 %v253_v29, %v252_v28  ;;  %v190_v48 = vunpack.c.l.bf16 %v1662_v36  ;;  %v191_v49 = vunpack.c.h.bf16 %v1662_v36 }
  0x30   :  { %v1359_v50 = vpack.c.bf16 %v267_v35, %v266_v32  ;;  %v204_v51 = vunpack.c.l.bf16 %v1664_v41  ;;  %v205_v53 = vunpack.c.h.bf16 %v1664_v41  ;;  %v1361_v54 = vpack.c.bf16 %v285_v39, %v284_v37 }
  0x31   :  { %v222_v55 = vunpack.c.l.bf16 %v1668_v46  ;;  %v223_v58 = vunpack.c.h.bf16 %v1668_v46  ;;  %v236_v59 = vmul.f32 %v172_v44, %v172_v44  ;;  %v237_v61 = vmul.f32 %v173_v45, %v173_v45 }
  0x32   :  { %v254_v62 = vmul.f32 %v190_v48, %v190_v48  ;;  %v268_v6 = vmul.f32 %v204_v51, %v204_v51  ;;  %v175_v21 = vunpack.c.h.bf16 %v1676_v5  ;;  %v192_v27 = vunpack.c.l.bf16 %v1678_v12 }
  0x33   :  { %1324 = vmatpush3.bf16.xpose.msra.mxu1 %v1323_v3  ;;  %v255_v3 = vmul.f32 %v191_v49, %v191_v49  ;;  %v286_v14 = vmul.f32 %v222_v55, %v222_v55  ;;  %v1331_v17 = vpack.c.bf16 %v237_v61, %v236_v59  ;;  %v193_v28 = vunpack.c.h.bf16 %v1678_v12  ;;  %v1692_v49 = vld [vmem:[#allocation4 + $0x38] sm:$0xff]  }
  0x34   :  { %1326 = vmatprep.subr.bf16.mxu1 %v1325_v11  ;;  %v269_v11 = vmul.f32 %v205_v53, %v205_v53  ;;  %v206_v32 = vunpack.c.l.bf16 %v1680_v16  ;;  %v207_v35 = vunpack.c.h.bf16 %v1680_v16  ;;  %v224_v39 = vunpack.c.l.bf16 %v1684_v22  ;;  %v1694_v55 = vld [vmem:[#allocation4 + $0xb8] sm:$0xff]  }
  0x35   :  { %1356 = vmatpush3.bf16.xpose.msra.mxu0 %v1355_v15  ;;  %v287_v15 = vmul.f32 %v223_v58, %v223_v58  ;;  %v1333_v24 = vpack.c.bf16 %v255_v3, %v254_v62  ;;  %v239_v45 = vmul.f32 %v175_v21, %v175_v21  ;;  %v257_v48 = vmul.f32 %v193_v28, %v193_v28 }
  0x36   :  { %1358 = vmatprep.subr.bf16.mxu0 %v1357_v19  ;;  %v174_v19 = vunpack.c.l.bf16 %v1676_v5  ;;  %v1363_v29 = vpack.c.bf16 %v269_v11, %v268_v6  ;;  %v271_v51 = vmul.f32 %v207_v35, %v207_v35  ;;  %v288_v53 = vmul.f32 %v224_v39, %v224_v39 }
  0x37   :  { %v1365_v37 = vpack.c.bf16 %v287_v15, %v286_v14  ;;  %v176_v59 = vunpack.c.l.bf16 %v1692_v49  ;;  %v177_v61 = vunpack.c.h.bf16 %v1692_v49  ;;  %v208_v6 = vunpack.c.l.bf16 %v1694_v55 }
  0x38   :  { %v238_v44 = vmul.f32 %v174_v19, %v174_v19  ;;  %v209_v11 = vunpack.c.h.bf16 %v1694_v55  ;;  %v440_v28 = vlaneseq }
  0x39   :  { %v240_v15 = vmul.f32 %v176_v59, %v176_v59  ;;  %v272_v19 = vmul.f32 %v208_v6, %v208_v6 }
  0x3a   :  { %v1335_v58 = vpack.c.bf16 %v239_v45, %v238_v44  ;;  %v273_v21 = vmul.f32 %v209_v11, %v209_v11 }
  0x3b   :  { %1328 = vmatpush3.bf16.xpose.msra.mxu1 %v1327_v42  ;;  %v225_v42 = vunpack.c.h.bf16 %v1684_v22 }
  0x3c   :  { %1330 = vmatprep.subr.bf16.mxu1 %v1329_v47  ;;  %v256_v47 = vmul.f32 %v192_v27, %v192_v27  ;;  %v1371_v27 = vpack.c.bf16 %v273_v21, %v272_v19 }
  0x3d   :  { %1360 = vmatpush3.bf16.xpose.msra.mxu0 %v1359_v50  ;;  %v270_v50 = vmul.f32 %v206_v32, %v206_v32 }
  0x3e   :  { %1362 = vmatprep.subr.bf16.mxu0 %v1361_v54  ;;  %v289_v54 = vmul.f32 %v225_v42, %v225_v42  ;;  %v1337_v62 = vpack.c.bf16 %v257_v48, %v256_v47 }
  0x3f   :  { %v1367_v3 = vpack.c.bf16 %v271_v51, %v270_v50 }
  0x40   :  { %v1369_v14 = vpack.c.bf16 %v289_v54, %v288_v53 }
  0x43   :  { %1332 = vmatpush3.bf16.xpose.msra.mxu1 %v1331_v17  ;;  %v241_v17 = vmul.f32 %v177_v61, %v177_v61 }
  0x44   :  { %1334 = vmatprep.subr.bf16.mxu1 %v1333_v24 }
  0x45   :  { %1364 = vmatpush3.bf16.xpose.msra.mxu0 %v1363_v29  ;;  %v1339_v24 = vpack.c.bf16 %v241_v17, %v240_v15  ;;  %v441_v29 = vand.u32 127, %v440_v28 }
  0x46   :  { %1366 = vmatprep.subr.bf16.mxu0 %v1365_v37 }
  0x47   :  { %v442_v32 = vadd.s32 128, %v441_v29  ;;  %v444_v37 = vadd.s32 384, %v441_v29 }
  0x4b   :  { %1336 = vmatpush3.bf16.xpose.msra.mxu1 %v1335_v58 }
  0x4c   :  { %1338 = vmatprep.subr.bf16.mxu1 %v1337_v62 }
  0x4d   :  { %1368 = vmatpush3.bf16.xpose.msra.mxu0 %v1367_v3 }
  0x4e   :  { %1370 = vmatprep.subr.bf16.mxu0 %v1369_v14 }
  0x53   :  { %1340 = vmatpush3.bf16.xpose.msra.mxu1 %v1339_v24 }
  0x54   :  { %1223 = vmatprep.subr.bf16.mxu1 %v1562_v4 }
  0x55   :  { %1372 = vmatpush3.bf16.xpose.msra.mxu0 %v1371_v27 }
  0x56   :  { %1241 = vmatprep.subr.bf16.mxu0 %v1568_v8 }
  0x5a   :  { %1188 = vmatmul.mubr.f32.vlgmr.msra.gmra.mrb[0].mxu1 %v1491_v1 }
  0x5b   :  { %1224 = vmatpush3.bf16.xpose.msra.mxu1 %v1566_v7  ;;  %1239 = vmatprep.mubr.bf16.mxu1 %v1587_v25 }
  0x5c   :  { %1222 = vmatmul.mubr.f32.vlgmr.msra.gmra.mrb[4].mxu0 %v1491_v1  ;;  %1225 = vmatprep.subr.bf16.mxu1 %v1575_v13 }
  0x5d   :  { %1242 = vmatpush3.bf16.xpose.msra.mxu0 %v1570_v9  ;;  %1257 = vmatprep.mubr.bf16.mxu0 %v1587_v25 }
  0x5e   :  { %1243 = vmatprep.subr.bf16.mxu0 %v1582_v23 }
  0x63   :  { %1226 = vmatpush3.bf16.xpose.msra.mxu1 %v1579_v18 }
  0x64   :  { %1227 = vmatprep.subr.bf16.mxu1 %v1596_v38 }
  0x65   :  { %1244 = vmatpush3.bf16.xpose.msra.mxu0 %v1592_v33 }
  0x66   :  { %1245 = vmatprep.subr.bf16.mxu0 %v1607_v52 }
  0x6b   :  { %1228 = vmatpush3.bf16.xpose.msra.mxu1 %v1600_v43 }
  0x6c   :  { %1229 = vmatprep.subr.bf16.mxu1 %v1616_v63 }
  0x6d   :  { %1246 = vmatpush3.bf16.xpose.msra.mxu0 %v1610_v57 }
  0x6e   :  { %1247 = vmatprep.subr.bf16.mxu0 %v1624_v20 }
  0x73   :  { %1230 = vmatpush3.bf16.xpose.msra.mxu1 %v1626_v26 }
  0x74   :  { %1231 = vmatprep.subr.bf16.mxu1 %v1630_v31 }
  0x75   :  { %1248 = vmatpush3.bf16.xpose.msra.mxu0 %v1632_v34 }
  0x76   :  { %1249 = vmatprep.subr.bf16.mxu0 %v1636_v40 }
  0x7b   :  { %1232 = vmatpush3.bf16.xpose.msra.mxu1 %v1644_v56 }
  0x7c   :  { %1233 = vmatprep.subr.bf16.mxu1 %v1646_v60 }
  0x7d   :  { %1250 = vmatpush3.bf16.xpose.msra.mxu0 %v1648_v2 }
  0x7e   :  { %1251 = vmatprep.subr.bf16.mxu0 %v1652_v10 }
  0x83   :  { %1234 = vmatpush3.bf16.xpose.msra.mxu1 %v1660_v30 }
  0x84   :  { %1235 = vmatprep.subr.bf16.mxu1 %v1662_v36 }
  0x85   :  { %1252 = vmatpush3.bf16.xpose.msra.mxu0 %v1664_v41 }
  0x86   :  { %1253 = vmatprep.subr.bf16.mxu0 %v1668_v46 }
  0x8b   :  { %1236 = vmatpush3.bf16.xpose.msra.mxu1 %v1676_v5 }
  0x8c   :  { %1237 = vmatprep.subr.bf16.mxu1 %v1678_v12 }
  0x8d   :  { %1254 = vmatpush3.bf16.xpose.msra.mxu0 %v1680_v16 }
  0x8e   :  { %1255 = vmatprep.subr.bf16.mxu0 %v1684_v22 }
  0x93   :  { %1238 = vmatpush3.bf16.xpose.msra.mxu1 %v1692_v49 }
  0x95   :  { %1256 = vmatpush3.bf16.xpose.msra.mxu0 %v1694_v55 }
  0x96   :  { %1259 = vmatprep.subr.bf16.mxu0 %v1562_v4 }
  0x97   :  { %v453_v35 = vpop.permute.xlu0 %452 }
  0x98   :  { %vm1743_vm1 = vcmp.eq.s32.totalorder %v442_v32, %v453_v35  ;;  %vm1754_vm3 = vcmp.eq.s32.totalorder %v441_v29, %v453_v35  ;;  %vm1762_vm4 = vcmp.eq.s32.totalorder %v444_v37, %v453_v35 }
  0x99   :  { %vm1145_vm2 = vmpackc.low %vm1743_vm1, %vm1743_vm1  ;;  %1139 = vmatprep.subr.msk.mxu1 %vm1743_vm1, %v1491_v1  ;;  %v1103_v17 = vsel %vm1754_vm3, 1.0, %v1489_v0  ;;  %v1104_v19 = vsel %vm1743_vm1, 1.0, %v1489_v0 }
  0x9a   :  { %1240 = vmatmul.mubr.bf16.vlgmr.msra.gmra.mrb[4].mxu1 %v1587_v25  ;;  %vm1147_vm5 = vmpackc.low %vm1754_vm3, %vm1754_vm3  ;;  %v887_v21 = vrot.slane %v1103_v17, 4  ;;  %v893_v24 = vrot.slane %v1104_v19, 4 }
  0x9b   :  { %809 = vmatprep.mubr.f32.mxu1 %v1489_v0  ;;  %1140 = vmatpush1.msk.msra.mxu1 %vm1754_vm3, %v1491_v1  ;;  %vm1149_vm8 = vmpackc.low %vm1762_vm4, %vm1762_vm4 }
  0x9c   :  { %1258 = vmatmul.mubr.bf16.vlgmr.msra.gmra.mrb[8].mxu0 %v1587_v25  ;;  %1142 = vmatprep.subr.msk.mxu1 %vm1762_vm4, %v1491_v1 }
  0x9d   :  { %1260 = vmatpush3.bf16.msra.mxu0 %v1566_v7  ;;  %v1493_v7 = vmov 1.0|1.0  }
  0x9e   :  { %1261 = vmatprep.subr.bf16.mxu0 %v1575_v13  ;;  %1146 = vmatprep.mubr.msk.bf16.mxu0 %vm1145_vm2, %v1493_v7 }
  0xa1   :  { %1262 = vmatpush3.bf16.msra.mxu0 %v1579_v18 }
  0xa2   :  { %1263 = vmatprep.subr.bf16.mxu0 %v1596_v38 }
  0xa5   :  { %1264 = vmatpush3.bf16.msra.mxu0 %v1600_v43 }
  0xa6   :  { %1265 = vmatprep.subr.bf16.mxu0 %v1616_v63  ;;  %v443_v63 = vadd.s32 256, %v441_v29  ;;  %v888_v29 = vadd.f32 %v1103_v17, %v887_v21 }
  0xa8   :  { %vm1783_vm7 = vcmp.eq.s32.totalorder %v443_v63, %v453_v35  ;;  %v894_v35 = vadd.f32 %v1104_v19, %v893_v24 }
  0xa9   :  { %1266 = vmatpush3.bf16.msra.mxu0 %v1626_v26  ;;  %vm1151_vm9 = vmpackc.low %vm1783_vm7, %vm1783_vm7  ;;  %v1105_v27 = vsel %vm1783_vm7, 1.0, %v1489_v0 }
  0xaa   :  { %1267 = vmatprep.subr.bf16.mxu0 %v1630_v31  ;;  %v899_v32 = vrot.slane %v1105_v27, 4 }
  0xad   :  { %1268 = vmatpush3.bf16.msra.mxu0 %v1644_v56 }
  0xae   :  { %1269 = vmatprep.subr.bf16.mxu0 %v1646_v60 }
  0xb1   :  { %1270 = vmatpush3.bf16.msra.mxu0 %v1660_v30 }
  0xb2   :  { %1271 = vmatprep.subr.bf16.mxu0 %v1662_v36 }
  0xb5   :  { %1272 = vmatpush3.bf16.msra.mxu0 %v1676_v5 }
  0xb6   :  { %1273 = vmatprep.subr.bf16.mxu0 %v1678_v12 }
  0xb9   :  { %1274 = vmatpush3.bf16.msra.mxu0 %v1692_v49 }
  0xbc   :  { %1148 = vmatmul.mubr.msk.bf16.vlgmr.msra.gmra.mrb[12].mxu0 %vm1147_vm5, %v1493_v7 }
  0xef   :  { %v90_v18 = vpop.f32.mrb[0].mxu0 }
  0xf0   :  { %97 = vst.msk [vmem:[#allocation2] sm:$0xff] %vm96_vm6, %v90_v18  ;;  %v1307_v25 = vpop.f32.mrb[1].mxu0  ;;  %v900_v18 = vadd.f32 %v1105_v27, %v899_v32 }
  0xf1   :  { %v93_v38 = vpop.f32.mrb[2].mxu0  ;;  %v895_v25 = vrot.slane %v894_v35, 2 }
  0xf2   :  { %v1308_v43 = vpop.f32.mrb[3].mxu0  ;;  %v901_v63 = vrot.slane %v900_v18, 2 }
  0xf7   :  { %v740_v26 = vld [vmem:[#allocation2] sm:$0xff] }
  0xf8   :  { %1141 = vmatmul.mubr.msk.f32.vlgmr.msra.gmra.mrb[2].mxu1 %vm96_vm6, %v740_v26 }
  0xf9   :  { %1143 = vmatpush1.msk.msra.mxu1 %vm1783_vm7, %v1491_v1  ;;  %880 = vmatprep.mubr.f32.mxu1 %v1489_v0 }
  0xfa   :  { %1281 = vmatprep.subr.bf16.mxu1 %v1568_v8 }
  0xfc   :  { %1144 = vmatmul.mubr.msk.f32.vlgmr.msra.gmra.mrb[8].mxu1 %vm96_vm6, %v740_v26  ;;  %v896_v26 = vadd.f32 %v895_v25, %v894_v35 }
  0xfd   :  { %1282 = vmatpush3.bf16.msra.mxu1 %v1570_v9  ;;  %1150 = vmatprep.mubr.msk.bf16.mxu1 %vm1149_vm8, %v1493_v7 }
  0xfe   :  { %1283 = vmatprep.subr.bf16.mxu1 %v1582_v23 }
 0x101   :  { %1284 = vmatpush3.bf16.msra.mxu1 %v1592_v33 }
 0x102   :  { %1285 = vmatprep.subr.bf16.mxu1 %v1607_v52 }
 0x105   :  { %1286 = vmatpush3.bf16.msra.mxu1 %v1610_v57 }
 0x106   :  { %1287 = vmatprep.subr.bf16.mxu1 %v1624_v20 }
 0x109   :  { %1288 = vmatpush3.bf16.msra.mxu1 %v1632_v34  ;;  %v916_v34 = vshrl.u32 %v440_v28, 7  ;;  %v1106_v28 = vsel %vm1762_vm4, 1.0, %v1489_v0 }
 0x10a   :  { %1289 = vmatprep.subr.bf16.mxu1 %v1636_v40  ;;  %v905_v37 = vrot.slane %v1106_v28, 4 }
 0x10b   :  { %v917_v40 = vsub.s32 0, %v916_v34  ;;  %v947_v34 = vstv %s1871_s4 }
 0x10c   :  { %v906_v38 = vadd.f32 %v1106_v28, %v905_v37 }
 0x10d   :  { %1290 = vmatpush3.bf16.msra.mxu1 %v1648_v2 }
 0x10e   :  { %1291 = vmatprep.subr.bf16.mxu1 %v1652_v10 }
 0x111   :  { %1292 = vmatpush3.bf16.msra.mxu1 %v1664_v41 }
 0x112   :  { %1293 = vmatprep.subr.bf16.mxu1 %v1668_v46 }
 0x115   :  { %1294 = vmatpush3.bf16.msra.mxu1 %v1680_v16 }
 0x116   :  { %1295 = vmatprep.subr.bf16.mxu1 %v1684_v22 }
 0x119   :  { %1296 = vmatpush3.bf16.msra.mxu1 %v1694_v55 }
 0x11c   :  { %1152 = vmatmul.mubr.msk.bf16.vlgmr.msra.gmra.mrb[12].mxu1 %vm1151_vm9, %v1493_v7  ;;  %v889_v7 = vrot.slane %v888_v29, 2 }
 0x11e   :  { %v890_v43 = vadd.f32 %v889_v7, %v888_v29 }
 0x12d   :  { %v356_v1 = vpop.f32.mrb[0].mxu1 }
 0x12e   :  { %v432_v8 = vmax.f32 %v356_v1, 1e-24  ;;  %v358_v9 = vpop.f32.mrb[1].mxu1  ;;  %v907_v1 = vrot.slane %v906_v38, 2 }
 0x12f   :  { %v433_v23 = vmax.f32 %v358_v9, 1e-24  ;;  %v427_v33 = vpop.f32.mrb[4].mxu0  ;;  %v902_v9 = vadd.f32 %v901_v63, %v900_v18 }
 0x130   :  { %1446 = vrsqrt.f32 %v432_v8  ;;  %v434_v52 = vmax.f32 %v427_v33, 1e-24  ;;  %v429_v57 = vpop.f32.mrb[5].mxu0  ;;  %v891_v8 = vrot.slane %v890_v43, 1  ;;  %v908_v33 = vadd.f32 %v907_v1, %v906_v38 }
 0x131   :  { %1448 = vrsqrt.f32 %v433_v23  ;;  %v435_v20 = vmax.f32 %v429_v57, 1e-24  ;;  %v897_v23 = vrot.slane %v896_v26, 1  ;;  %v903_v57 = vrot.slane %v902_v9, 1 }
 0x132   :  { %1450 = vrsqrt.f32 %v434_v52  ;;  %v892_v52 = vadd.f32 %v891_v8, %v890_v43  ;;  %v909_v0 = vrot.slane %v908_v33, 1 }
 0x133   :  { %1452 = vrsqrt.f32 %v435_v20  ;;  %v898_v20 = vadd.f32 %v897_v23, %v896_v26 }
 0x134   :  { %vm911_vm10 = vcmp.gt.f32.partialorder %v892_v52, 0.0 }
 0x135   :  { %vm912_vm11 = vcmp.gt.f32.partialorder %v898_v20, 0.0 }
 0x13a   :  { %v1447_v56 = vpop.eup %1446 }
 0x13b   :  { %v1449_v60 = vpop.eup %1448  ;;  %v918_v2 = vrot.slane %v1447_v56, %v917_v40  ;;  %v904_v56 = vadd.f32 %v903_v57, %v902_v9 }
 0x13c   :  { %v1451_v10 = vpop.eup %1450  ;;  %v922_v30 = vrot.slane %v1449_v60, %v917_v40 }
 0x13d   :  { %v1453_v36 = vpop.eup %1452  ;;  %v926_v41 = vrot.slane %v1451_v10, %v917_v40  ;;  %v961_v46 = vsel %vm1754_vm3, %v918_v2, 0.0  ;;  %v910_v10 = vadd.f32 %v909_v0, %v908_v33  ;;  %vm913_vm12 = vcmp.gt.f32.partialorder %v904_v56, 0.0 }
 0x13e   :  { %v930_v5 = vrot.slane %v1453_v36, %v917_v40  ;;  %v962_v12 = vsel %vm1743_vm1, %v922_v30, 0.0 }
 0x13f   :  { %v965_v16 = vadd.f32 %v962_v12, %v961_v46  ;;  %v963_v22 = vsel %vm1783_vm7, %v926_v41, 0.0  ;;  %vm914_vm13 = vcmp.gt.f32.partialorder %v910_v10, 0.0 }
 0x140   :  { %v964_v44 = vsel %vm1762_vm4, %v930_v5, 0.0 }
 0x141   :  { %v966_v42 = vadd.f32 %v965_v16, %v963_v22 }
 0x143   :  { %v967_v45 = vadd.f32 %v966_v42, %v964_v44 }
 0x145   :  { %968 = vadd.xlane.f32.xlu1 %v967_v45 }
 0x16d   :  { %v692_v47 = vpop.f32.mrb[4].mxu1 }
 0x16e   :  { %v931_v48 = vmul.f32 %v918_v2, %v692_v47  ;;  %v694_v49 = vpop.f32.mrb[5].mxu1 }
 0x16f   :  { %v932_v50 = vmul.f32 %v922_v30, %v694_v49  ;;  %v733_v51 = vpop.f32.mrb[8].mxu0  ;;  %v696_v53 = vpop.f32.mrb[6].mxu1 }
 0x170   :  { %v933_v54 = vmul.f32 %v926_v41, %v733_v51  ;;  %v735_v55 = vpop.f32.mrb[9].mxu0  ;;  %v697_v58 = vpop.f32.mrb[7].mxu1 }
 0x171   :  { %v934_v59 = vmul.f32 %v930_v5, %v735_v55  ;;  %v737_v61 = vpop.f32.mrb[10].mxu0 }
 0x172   :  { %v738_v62 = vpop.f32.mrb[11].mxu0 }
 0x18f   :  { %v1275_v3 = vpop.f32.mrb[12].mxu0 }
 0x190   :  { %v1276_v6 = vpop.f32.mrb[13].mxu0 }
 0x191   :  { %v1822_v11 = vadd.f32 %v1276_v6, %v1275_v3  ;;  %v1278_v14 = vpop.f32.mrb[14].mxu0 }
 0x192   :  { %v1279_v15 = vpop.f32.mrb[15].mxu0 }
 0x1cb   :  { %v811_v40 = vpop.f32.mrb[2].mxu1 }
 0x1cc   :  { %v943_v60 = vsel %vm911_vm10, %v811_v40, %v931_v48  ;;  %v813_v2 = vpop.f32.mrb[3].mxu1 }
 0x1cd   :  { %v948_v30 = vmul.f32 %v947_v34, %v943_v60  ;;  %v944_v36 = vsel %vm912_vm11, %v813_v2, %v932_v50 }
 0x1ce   :  { %v949_v41 = vmul.f32 %v947_v34, %v944_v36 }
 0x1cf   :  { %v882_v46 = vpop.f32.mrb[8].mxu1  ;;  %v952_v5 = vsel %vm1754_vm3, %v948_v30, 0.0 }
 0x1d0   :  { %v945_v12 = vsel %vm913_vm12, %v882_v46, %v933_v54  ;;  %v884_v16 = vpop.f32.mrb[9].mxu1  ;;  %v953_v22 = vsel %vm1743_vm1, %v949_v41, 0.0  ;;  %v1054_v4 = vmax.f32 %v948_v30, %v949_v41 }
 0x1d1   :  { %v950_v42 = vmul.f32 %v947_v34, %v945_v12  ;;  %v946_v44 = vsel %vm914_vm13, %v884_v16, %v934_v59  ;;  %v956_v45 = vadd.f32 %v953_v22, %v952_v5 }
 0x1d2   :  { %v951_v47 = vmul.f32 %v947_v34, %v946_v44  ;;  %v969_v48 = vpop.xlane.xlu1 %968 }
 0x1d3   :  { %v954_v49 = vsel %vm1783_vm7, %v950_v42, 0.0  ;;  %1080 = vst.msk [vmem:[%s1875_s8] sm:$0xff] %vm1059_vm14, %v969_v48 }
 0x1d4   :  { %v1055_v50 = vmax.f32 %v950_v42, %v951_v47  ;;  %v955_v39 = vsel %vm1762_vm4, %v951_v47, 0.0  ;;  %v957_v51 = vadd.f32 %v956_v45, %v954_v49 }
 0x1d6   :  { %v1056_v53 = vmax.f32 %v1054_v4, %v1055_v50  ;;  %v958_v54 = vadd.f32 %v957_v51, %v955_v39 }
 0x1d8   :  { %1057 = vmax.xlane.f32.xlu0 %v1056_v53  ;;  %959 = vadd.xlane.f32.xlu1 %v958_v54 }
 0x1ef   :  { %v1297_v55 = vpop.f32.mrb[12].mxu1 }
 0x1f0   :  { %v1298_v58 = vpop.f32.mrb[13].mxu1 }
 0x1f1   :  { %v1299_v59 = vadd.f32 %v1298_v58, %v1297_v55  ;;  %v1300_v31 = vpop.f32.mrb[14].mxu1 }
 0x1f2   :  { %v1301_v61 = vpop.f32.mrb[15].mxu1 }
 0x1f3   :  { %v1049_v62 = vadd.f32 %v1299_v59, %v1822_v11 }
 0x1f5   :  { %1081 = vst [vmem:[%s1876_s9] sm:$0xff] %v1049_v62 }
 0x265   :  { %v1058_v3 = vpop.xlane.xlu0 %1057  ;;  %v960_v6 = vpop.xlane.xlu1 %959 }
 0x266   :  { %1060 = vst.msk [vmem:[%s1872_s5] sm:$0xff] %vm1059_vm14, %v1058_v3  ;;  %v1061_v13 = vsub.f32 %v948_v30, %v1058_v3  ;;  %v1062_v14 = vsub.f32 %v949_v41, %v1058_v3  ;;  %v1063_v15 = vsub.f32 %v950_v42, %v1058_v3  ;;  %1079 = vst.msk [vmem:[%s1874_s7] sm:$0xff] %vm1059_vm14, %v960_v6 }
 0x267   :  { %v1064_v11 = vsub.f32 %v951_v47, %v1058_v3 }
 0x268   :  { %v1065_v17 = vmul.f32 1.442695, %v1061_v13  ;;  %v1067_v19 = vmul.f32 1.442695, %v1062_v14  ;;  %v1069_v21 = vmul.f32 1.442695, %v1063_v15 }
 0x269   :  { %v1071_v24 = vmul.f32 1.442695, %v1064_v11 }
 0x26a   :  { %1454 = vpow2.f32 %v1065_v17 }
 0x26b   :  { %1456 = vpow2.f32 %v1067_v19 }
 0x26c   :  { %1458 = vpow2.f32 %v1069_v21 }
 0x26d   :  { %1460 = vpow2.f32 %v1071_v24 }
 0x274   :  { %v1455_v27 = vpop.eup %1454 }
 0x275   :  { %v1457_v28 = vpop.eup %1456 }
 0x276   :  { %v1073_v29 = vadd.f32 %v1457_v28, %v1455_v27  ;;  %v1459_v32 = vpop.eup %1458 }
 0x277   :  { %v1461_v37 = vpop.eup %1460 }
 0x278   :  { %v1074_v35 = vadd.f32 %v1459_v32, %v1073_v29 }
 0x27a   :  { %v1075_v7 = vadd.f32 %v1461_v37, %v1074_v35 }
 0x27c   :  { %1076 = vadd.xlane.f32.xlu1 %v1075_v7 }
 0x309   :  { %v1077_v18 = vpop.xlane.xlu1 %1076 }
 0x30a   :  { %1078 = vst.msk [vmem:[%s1873_s6] sm:$0xff] %vm1059_vm14, %v1077_v18 }
 0x30b   :  { %1102 = vsyncpa [#allocation5], 1 }

</bundles_post_ra>
